<compile_context>
chip_gen: v5e
topology: v5e:2x2
jax: 0.10.0
libtpu: 0.0.40
codegen_flags: <defaults>
</compile_context>

<pallas_src>
import functools

import jax
import jax.numpy as jnp
from jax import lax
from jax.experimental import pallas as pl
from jax.experimental.pallas import tpu as pltpu


_INV_SQRT2 = 0.7071067811865476
_MASK_FILL = -10e4   # value used by the repo's generate_padding_mask


def _round_up(x, m):
    return ((x + m - 1) // m) * m


# ----------------------------------------------------------------------------
# Fused projection + GELU:   out = gelu(x @ W + b)
#   x tile:  [TM, F] (native dtype, cast to bf16 in-kernel for the MXU)
#   W:       [F, D]  bf16, resident in VMEM across the grid
#   b:       [1, D]  f32
#   out tile:[TM, D] f32
# ----------------------------------------------------------------------------
def _proj_gelu_kernel(x_ref, w_ref, b_ref, o_ref, *, mxu_dtype):
    x = x_ref[...].astype(mxu_dtype)         # in-kernel cast: no extra HBM pass
    y = jnp.dot(x, w_ref[...], preferred_element_type=jnp.float32)
    y = y + b_ref[...]                        # broadcast [1, D] over rows, f32
    # exact (erf-based) GELU, matching torch.nn.GELU() default
    g = 0.5 * y * (1.0 + lax.erf(y * jnp.float32(_INV_SQRT2)))
    # TODO(synk): dropout is identity in eval mode; training-mode dropout would
    # use pltpu.prng_seed / pltpu.prng_random_bits here.
    o_ref[...] = g.astype(o_ref.dtype)


def proj_gelu(features, weight, bias, *, tile_m=1024, mxu_dtype=jnp.bfloat16):
    """features: [B, L, F], weight: [F, D], bias: [D] -> [B, L, D] (f32)."""
    B, L, F = features.shape
    D = weight.shape[1]
    M = B * L

    # Row-tile size: multiple of 8 (f32 sublane), clamped to the problem size.
    TM = min(int(tile_m), _round_up(M, 8))
    grid_m = pl.cdiv(M, TM)

    x2d = features.reshape(M, F)                       # streamed, native dtype
    w = weight.astype(mxu_dtype)                       # small, cast once
    b2d = bias.astype(jnp.float32).reshape(1, D)

    xb = jnp.dtype(features.dtype).itemsize
    wb = jnp.dtype(mxu_dtype).itemsize
    ob = 4  # f32 output
    # Working set: double-buffered x tile + double-buffered out tile
    #              + resident weight + bias.  Keep under v7x's 64 MiB VMEM.
    work_bytes = (2 * TM * F * xb) + (2 * TM * D * ob) + (F * D * wb) + 4 * D
    vmem_limit = int(min(max(2 * work_bytes, 8 << 20), 64 << 20))

    cost = pl.CostEstimate(
        flops=2 * M * F * D,
        transcendentals=M * D,
        bytes_accessed=xb * M * F + wb * F * D + ob * M * D + 4 * D,
    )

    kernel = functools.partial(_proj_gelu_kernel, mxu_dtype=mxu_dtype)

    out2d = pl.pallas_call(
        kernel,
        out_shape=jax.ShapeDtypeStruct((M, D), jnp.float32),
        grid_spec=pltpu.PrefetchScalarGridSpec(
            num_scalar_prefetch=0,
            grid=(grid_m,),
            in_specs=[
                pl.BlockSpec((TM, F), lambda i: (i, 0)),   # streamed x tiles
                pl.BlockSpec((F, D), lambda i: (0, 0)),    # resident weight
                pl.BlockSpec((1, D), lambda i: (0, 0)),    # resident bias
            ],
            out_specs=pl.BlockSpec((TM, D), lambda i: (i, 0)),
        ),
        compiler_params=pltpu.CompilerParams(
            dimension_semantics=("parallel",),   # megacore sharding on v7x
            vmem_limit_bytes=vmem_limit,
        ),
        cost_estimate=cost,
    )(x2d, w, b2d)
    return out2d.reshape(B, L, D)


# ----------------------------------------------------------------------------
# Padding mask: 0.0 for real tokens, -10e4 for padding tokens.
# Trivial elementwise op on [B, L]; left to XLA (fuses with neighbors) instead
# of a dedicated pallas_call that would pay launch overhead and masked
# (<128-lane) partial stores for small L.
# ----------------------------------------------------------------------------
def generate_padding_mask(input_ids, padding_idx):
    return jnp.where(input_ids == padding_idx,
                     jnp.float32(_MASK_FILL), jnp.float32(0.0))


# ----------------------------------------------------------------------------
# TextEmbedding wrapper (synthetic parameters, deterministic init)
# ----------------------------------------------------------------------------
class TextEmbeddingPallas:
    def __init__(self, d_features, d_model, pad_token_id=1, key=None,
                 tile_m=1024, mxu_dtype=jnp.bfloat16):
        if key is None:
            key = jax.random.PRNGKey(0)
        kw, kb = jax.random.split(key)
        # nn.Linear(d_features, d_model): weight [d_model, d_features]; we store
        # its transpose [d_features, d_model] for x @ W.
        bound = 1.0 / jnp.sqrt(d_features)
        self.weight = jax.random.uniform(
            kw, (d_features, d_model), jnp.float32, -bound, bound)
        self.bias = jax.random.uniform(
            kb, (d_model,), jnp.float32, -bound, bound)
        self.pad_token_id = pad_token_id
        self.tile_m = tile_m
        self.mxu_dtype = mxu_dtype

    def __call__(self, features, input_ids):
        # features: [B, L, d_features] — stands in for encoder.last_hidden_state
        # input_ids: [B, L] int32      — stands in for tokenizer output
        # TODO(synk): HF tokenizer + pretrained encoder have no Pallas
        # equivalent; their output is taken as the kernel input.
        out = proj_gelu(features, self.weight, self.bias,
                        tile_m=self.tile_m, mxu_dtype=self.mxu_dtype)
        padding_mask = generate_padding_mask(input_ids, self.pad_token_id)
        return out, padding_mask


if __name__ == "__main__":
    key = jax.random.PRNGKey(0)
    k_feat, k_ids, k_params = jax.random.split(key, 3)

    B, L = 2, 8          # batch, max_length (seq)
    D_FEATURES = 32      # encoder hidden size
    D_MODEL = 32         # projection target size
    PAD_ID = 1

    features = jax.random.normal(k_feat, (B, L, D_FEATURES), dtype=jnp.float32)
    input_ids = jax.random.randint(k_ids, (B, L), 0, 100, dtype=jnp.int32)
    # force some padding positions at the tail of each sequence
    input_ids = input_ids.at[:, -3:].set(PAD_ID)

    model = TextEmbeddingPallas(D_FEATURES, D_MODEL, pad_token_id=PAD_ID,
                                key=k_params)

    out, padding_mask = model(features, input_ids)
    out = jax.block_until_ready(out)
    padding_mask = jax.block_until_ready(padding_mask)

    # Reference 1: same bf16 matmul operands / f32 accumulation as the kernel.
    xb = features.reshape(B * L, D_FEATURES).astype(jnp.bfloat16)
    wb = model.weight.astype(jnp.bfloat16)
    ref = jnp.dot(xb, wb, preferred_element_type=jnp.float32) + model.bias
    ref = 0.5 * ref * (1.0 + lax.erf(ref * jnp.float32(_INV_SQRT2)))
    ref = ref.reshape(B, L, D_MODEL)
    assert jnp.allclose(out, ref, atol=1e-3, rtol=1e-3)

    # Reference 2: torch-style pure-f32 linear+GELU; only bf16 operand
    # quantization separates us from it, so a coarse tolerance suffices.
    ref32 = features.reshape(B * L, D_FEATURES) @ model.weight + model.bias
    ref32 = 0.5 * ref32 * (1.0 + lax.erf(ref32 * jnp.float32(_INV_SQRT2)))
    ref32 = ref32.reshape(B, L, D_MODEL)
    assert jnp.allclose(out, ref32, atol=5e-2, rtol=5e-2)

    ref_mask = jnp.where(input_ids == PAD_ID, -10e4, 0.0).astype(jnp.float32)
    assert jnp.allclose(padding_mask, ref_mask)

    print("KERNEL_OK")
</pallas_src>

<mosaic_0001>
module attributes {stable_mosaic.version = 11 : i64} {
  func.func @_proj_gelu_kernel(%arg0: i32, %arg1: memref<16x32xf32, #tpu.memory_space<vmem>>, %arg2: memref<32x32xbf16, #tpu.memory_space<vmem>>, %arg3: memref<1x32xf32, #tpu.memory_space<vmem>>, %arg4: memref<16x32xf32, #tpu.memory_space<vmem>>) attributes {dimension_semantics = [#tpu.dimension_semantics<parallel>], iteration_bounds = array<i64: 1>, scalar_prefetch = 0 : i64, scratch_operands = 0 : i64, tpu.core_type = #tpu.core_type<tc>, window_params = [{transform_indices = @transform_0, window_bounds = array<i64: 16, 32>}, {pipeline_mode = #tpu.pipeline_mode<synchronous>, transform_indices = @transform_1, window_bounds = array<i64: 32, 32>}, {pipeline_mode = #tpu.pipeline_mode<synchronous>, transform_indices = @transform_2, window_bounds = array<i64: 1, 32>}, {transform_indices = @transform_3, window_bounds = array<i64: 16, 32>}]} {
    %c0 = arith.constant 0 : index
    %c0_0 = arith.constant 0 : index
    %0 = vector.load %arg1[%c0, %c0_0] : memref<16x32xf32, #tpu.memory_space<vmem>>, vector<16x32xf32>
    %1 = arith.truncf %0 : vector<16x32xf32> to vector<16x32xbf16>
    %c0_1 = arith.constant 0 : index
    %c0_2 = arith.constant 0 : index
    %2 = vector.load %arg2[%c0_1, %c0_2] : memref<32x32xbf16, #tpu.memory_space<vmem>>, vector<32x32xbf16>
    %cst = arith.constant dense<0.000000e+00> : vector<16x32xf32>
    %3 = tpu.matmul %1, %2, %cst {dimension_numbers = #tpu.dot_dimension_numbers<[1], [0], [0], [1], [0, 0, 1, 1], [], []>} : vector<16x32xbf16>, vector<32x32xbf16>, vector<16x32xf32> -> vector<16x32xf32>
    %c0_3 = arith.constant 0 : index
    %c0_4 = arith.constant 0 : index
    %4 = vector.load %arg3[%c0_3, %c0_4] : memref<1x32xf32, #tpu.memory_space<vmem>>, vector<1x32xf32>
    %5 = vector.broadcast %4 : vector<1x32xf32> to vector<16x32xf32>
    %6 = arith.addf %3, %5 : vector<16x32xf32>
    %cst_5 = arith.constant 5.000000e-01 : f32
    %7 = vector.broadcast %cst_5 : f32 to vector<16x32xf32>
    %8 = arith.mulf %7, %6 : vector<16x32xf32>
    %cst_6 = arith.constant 0.707106769 : f32
    %9 = vector.broadcast %cst_6 : f32 to vector<16x32xf32>
    %10 = arith.mulf %6, %9 : vector<16x32xf32>
    %11 = math.erf %10 : vector<16x32xf32>
    %cst_7 = arith.constant 1.000000e+00 : f32
    %12 = vector.broadcast %cst_7 : f32 to vector<16x32xf32>
    %13 = arith.addf %12, %11 : vector<16x32xf32>
    %14 = arith.mulf %8, %13 : vector<16x32xf32>
    %c0_8 = arith.constant 0 : index
    %c0_9 = arith.constant 0 : index
    %15 = vector.load %arg4[%c0_8, %c0_9] : memref<16x32xf32, #tpu.memory_space<vmem>>, vector<16x32xf32>
    tpu.vector_store %arg4[%c0_8, %c0_9], %14 {strides = array<i32>} : memref<16x32xf32, #tpu.memory_space<vmem>>, vector<16x32xf32>,
    return
  }
  func.func @transform_0(%arg0: i32) -> (i32, i32) {
    %c0_i32 = arith.constant 0 : i32
    %c0_i32_0 = arith.constant 0 : i32
    return %arg0, %c0_i32 : i32, i32
  }
  func.func @transform_1(%arg0: i32) -> (i32, i32) {
    %c0_i32 = arith.constant 0 : i32
    %c0_i32_0 = arith.constant 0 : i32
    %c0_i32_1 = arith.constant 0 : i32
    return %c0_i32, %c0_i32_0 : i32, i32
  }
  func.func @transform_2(%arg0: i32) -> (i32, i32) {
    %c0_i32 = arith.constant 0 : i32
    %c0_i32_0 = arith.constant 0 : i32
    %c0_i32_1 = arith.constant 0 : i32
    return %c0_i32, %c0_i32_0 : i32, i32
  }
  func.func @transform_3(%arg0: i32) -> (i32, i32) {
    %c0_i32 = arith.constant 0 : i32
    %c0_i32_0 = arith.constant 0 : i32
    return %arg0, %c0_i32 : i32, i32
  }
}

</mosaic_0001>

<bundles_post_ra>
// kernel: tpu_custom_call.1
= control target key start
LH: loop header
LB: loop body
LE: loop exit
PB: predicated region body
PF: predicated region fallthrough
CT: control target
= control target key end

     0   :  { %8 = vsyncpa [#allocation3], 0  ;;  %s363_s0 = inlined_call_operand.hbm [shape: f32[16,32], index: 0, kind: input, shape index: {}]   ;;  %s364_s1 = inlined_call_operand.hbm [shape: bf16[32,32], index: 1, kind: input, shape index: {}]   ;;  %s365_s2 = inlined_call_operand.vmem [shape: f32[1,32], index: 2, kind: input, shape index: {}]   ;;  %s366_s3 = inlined_call_operand.hbm [shape: f32[16,32], index: 3, kind: output, shape index: {}]  }
   0x1   :  { %9 = vsyncpa [#allocation6], 0 }
   0x2   :  { %10 = vsyncpa [#allocation4], 0  ;;  %s15_s14 = sshll.u32 %s363_s0, 4  ;;  %s302_s15 = smov [#allocation2]   ;;  %s16_s14 = int_to_ptr.hbm [resolvable:$true] %s15_s14 }
   0x3   :  { %s17_s16 = sshll.u32 %s302_s15, 4  ;;  %s28_s19 = sshll.u32 %s364_s1, 4  ;;  %s18_s16 = int_to_ptr.vmem [resolvable:$true] %s17_s16  ;;  %s29_s19 = int_to_ptr.hbm [resolvable:$true] %s28_s19 }
   0x4   :  { %s303_s20 = smov 128   ;;  %s304_s21 = smov 8  }
   0x5   :  { %23 = dma.hbm_to_vmem [thread:$0]  %s16_s14, 256, %s18_s16, [#allocation3], %s303_s20, %s303_s20, %s304_s21  }
   0x6   :  { %s305_s22 = smov [#allocation5]   ;;  %s306_s24 = smov 64  }
   0x7   :  { %s30_s23 = sshll.u32 %s305_s22, 4  ;;  %s307_s0 = smov 4   ;;  %s31_s23 = int_to_ptr.vmem [resolvable:$true] %s30_s23 }
   0x8   :  { %36 = dma.hbm_to_vmem [thread:$0]  %s29_s19, 256, %s31_s23, [#allocation6], %s306_s24, %s306_s24, %s307_s0  }
   0x9   :  { %296 = dma.done.wait [#allocation3], 256  }
   0xa   :  { %297 = vsyncadd [#allocation3], 4294967040 }
   0xb   :  { %298 = dma.done.wait [#allocation6], 256  }
   0xc   :  { %299 = vsyncadd [#allocation6], 4294967040  ;;  %v211_v0 = vld [vmem:[#allocation5 + $0x8] sm:$0xff]  ;;  %v210_v1 = vld [vmem:[#allocation5] sm:$0xff]  ;;  %vm71_vm0 = vcmask 261120   ;;  %s185_s29 = sshll.u32 %s366_s3, 4  ;;  %s186_s29 = int_to_ptr.hbm [resolvable:$true] %s185_s29 }
   0xd   :  { %81 = vmatpush.bf16.msra.mxu0 %v211_v0  ;;  %v48_v2 = vld [vmem:[#allocation2] sm:$0xff]  ;;  %v49_v3 = vld [vmem:[#allocation2 + $0x8] sm:$0xff] }
   0xe   :  { %v50_v4 = vpack.c.bf16 %v49_v3, %v48_v2  ;;  %v219_v5 = vld [vmem:[%s365_s2] ss:$0 sm:$0xff]  ;;  %s308_s2 = smov [#allocation7]  }
   0xf   :  { %s183_s26 = sshll.u32 %s308_s2, 4  ;;  %s184_s26 = int_to_ptr.vmem [resolvable:$true] %s183_s26 }
  0x11   :  { %82 = vmatpush.bf16.msra.mxu0 %v210_v1 }
  0x14   :  { %207 = vmatmul.msk.bf16.vlgmr.msra.gmra.mxu0 %vm71_vm0, %v50_v4 }
  0x91   :  { %v84_v6 = vpop.f32.mrf.mxu0 }
  0x92   :  { %v342_v7 = vadd.f32 %v219_v5, %v84_v6 }
  0x94   :  { %v91_v8 = vmul.f32 0.70710677, %v342_v7 }
  0x96   :  { %v93_v9 = vmul.f32 %v91_v8, %v91_v8 }
  0x98   :  { %v94_v10 = vmin.f32 %v93_v9, 16.0 }
  0x99   :  { %v86_v11 = vpop.f32.mrf.mxu0 }
  0x9a   :  { %v95_v12 = vmul.f32 2.1237322e-06, %v94_v10  ;;  %v106_v13 = vmul.f32 3.8918573e-05, %v94_v10  ;;  %v345_v14 = vadd.f32 %v219_v5, %v86_v11 }
  0x9c   :  { %v96_v15 = vadd.f32 0.00028619796, %v95_v12  ;;  %v107_v16 = vadd.f32 0.001143296, %v106_v13  ;;  %v348_v17 = vmul.f32 0.70710677, %v345_v14 }
  0x9d   :  { %v89_v13 = vmul.f32 0.5, %v342_v7  ;;  %v90_v7 = vmul.f32 0.5, %v345_v14 }
  0x9e   :  { %v97_v18 = vmul.f32 %v96_v15, %v94_v10  ;;  %v108_v19 = vmul.f32 %v107_v16, %v94_v10  ;;  %v133_v20 = vmul.f32 %v348_v17, %v348_v17 }
  0xa0   :  { %v109_v21 = vadd.f32 0.014752088, %v108_v19  ;;  %v98_v22 = vadd.f32 0.0036580483, %v97_v18  ;;  %v134_v23 = vmin.f32 %v133_v20, 16.0 }
  0xa2   :  { %v110_v24 = vmul.f32 %v109_v21, %v94_v10  ;;  %v135_v25 = vmul.f32 2.1237322e-06, %v134_v23  ;;  %v146_v26 = vmul.f32 3.8918573e-05, %v134_v23  ;;  %v99_v28 = vmul.f32 %v98_v22, %v94_v10 }
  0xa4   :  { %v111_v27 = vadd.f32 0.112945676, %v110_v24  ;;  %v136_v29 = vadd.f32 0.00028619796, %v135_v25  ;;  %v147_v30 = vadd.f32 0.001143296, %v146_v26 }
  0xa5   :  { %v100_v35 = vadd.f32 0.05243302, %v99_v28 }
  0xa6   :  { %v112_v31 = vmul.f32 %v111_v27, %v94_v10  ;;  %v137_v32 = vmul.f32 %v136_v29, %v134_v23  ;;  %v148_v33 = vmul.f32 %v147_v30, %v134_v23 }
  0xa7   :  { %v101_v41 = vmul.f32 %v100_v35, %v94_v10 }
  0xa8   :  { %v113_v34 = vadd.f32 0.4994258, %v112_v31  ;;  %v149_v36 = vadd.f32 0.014752088, %v148_v33  ;;  %v138_v38 = vadd.f32 0.0036580483, %v137_v32 }
  0xa9   :  { %v102_v45 = vadd.f32 0.18741608, %v101_v41 }
  0xaa   :  { %v114_v37 = vmul.f32 %v113_v34, %v94_v10  ;;  %v150_v39 = vmul.f32 %v149_v36, %v134_v23  ;;  %v139_v43 = vmul.f32 %v138_v38, %v134_v23 }
  0xab   :  { %v103_v50 = vmul.f32 %v102_v45, %v94_v10 }
  0xac   :  { %v115_v40 = vadd.f32 1.0, %v114_v37  ;;  %v151_v42 = vadd.f32 0.112945676, %v150_v39  ;;  %v140_v47 = vadd.f32 0.05243302, %v139_v43 }
  0xad   :  { %v104_v56 = vadd.f32 1.1283791, %v103_v50 }
  0xae   :  { %220 = vrcp.f32 %v115_v40  ;;  %v152_v44 = vmul.f32 %v151_v42, %v134_v23  ;;  %v141_v53 = vmul.f32 %v140_v47, %v134_v23  ;;  %v127_v55 = vand.u32 2147483648, %v115_v40 }
  0xaf   :  { %v125_v58 = vand.u32 2147483647, %v115_v40  ;;  %vm121_vm2 = vweird.f32 %v115_v40  ;;  %v105_v63 = vmul.f32 %v104_v56, %v91_v8 }
  0xb0   :  { %v153_v46 = vadd.f32 0.4994258, %v152_v44  ;;  %v142_v59 = vadd.f32 0.18741608, %v141_v53  ;;  %v128_v61 = vor.u32 1.1754944e-38, %v127_v55 }
  0xb1   :  { %vm126_vm4 = vcmp.eq.f32.partialorder %v125_v58, 8.507059e+37 }
  0xb2   :  { %v154_v48 = vmul.f32 %v153_v46, %v134_v23  ;;  %v143_v2 = vmul.f32 %v142_v59, %v134_v23 }
  0xb4   :  { %v221_v49 = vpop.eup %220  ;;  %v155_v52 = vadd.f32 1.0, %v154_v48  ;;  %v144_v10 = vadd.f32 1.1283791, %v143_v2 }
  0xb5   :  { %v117_v51 = vmul.f32 %v221_v49, %v115_v40  ;;  %vm122_vm1 = vweird.f32 %v221_v49 }
  0xb6   :  { %222 = vrcp.f32 %v155_v52  ;;  %vm123_vm3 = vmor %vm121_vm2, %vm122_vm1  ;;  %v167_v9 = vand.u32 2147483648, %v155_v52  ;;  %v165_v12 = vand.u32 2147483647, %v155_v52  ;;  %vm161_vm6 = vweird.f32 %v155_v52 }
  0xb7   :  { %v118_v54 = vsub.f32 1.0, %v117_v51  ;;  %v145_v19 = vmul.f32 %v144_v10, %v348_v17 }
  0xb8   :  { %v168_v8 = vor.u32 1.1754944e-38, %v167_v9  ;;  %vm166_vm8 = vcmp.eq.f32.partialorder %v165_v12, 8.507059e+37 }
  0xb9   :  { %v119_v57 = vmul.f32 %v221_v49, %v118_v54 }
  0xbb   :  { %v120_v60 = vadd.f32 %v221_v49, %v119_v57 }
  0xbc   :  { %v223_v62 = vpop.eup %222 }
  0xbd   :  { %v124_v0 = vsel %vm123_vm3, %v221_v49, %v120_v60  ;;  %v157_v3 = vmul.f32 %v223_v62, %v155_v52  ;;  %vm162_vm5 = vweird.f32 %v223_v62 }
  0xbe   :  { %v129_v1 = vsel %vm126_vm4, %v128_v61, %v124_v0  ;;  %vm163_vm7 = vmor %vm161_vm6, %vm162_vm5 }
  0xbf   :  { %v130_v4 = vmul.f32 %v129_v1, %v105_v63  ;;  %v158_v5 = vsub.f32 1.0, %v157_v3 }
  0xc1   :  { %v208_v6 = vclamps-f32 %v130_v4, 1.0  ;;  %v159_v11 = vmul.f32 %v223_v62, %v158_v5 }
  0xc3   :  { %v173_v15 = vadd.f32 1.0, %v208_v6  ;;  %v160_v16 = vadd.f32 %v223_v62, %v159_v11 }
  0xc5   :  { %v175_v18 = vmul.f32 %v173_v15, %v89_v13  ;;  %v164_v20 = vsel %vm163_vm7, %v223_v62, %v160_v16 }
  0xc6   :  { %v169_v21 = vsel %vm166_vm8, %v168_v8, %v164_v20 }
  0xc7   :  { %177 = vst.msk [vmem:[#allocation7] sm:$0xff] %vm71_vm0, %v175_v18  ;;  %v170_v22 = vmul.f32 %v169_v21, %v145_v19 }
  0xc9   :  { %v209_v23 = vclamps-f32 %v170_v22, 1.0 }
  0xcb   :  { %v174_v24 = vadd.f32 1.0, %v209_v23 }
  0xcd   :  { %v176_v25 = vmul.f32 %v174_v24, %v90_v7 }
  0xcf   :  { %178 = vst.msk [vmem:[#allocation7 + $0x8] sm:$0xff] %vm71_vm0, %v176_v25 }
  0xd0   :  { %191 = dma.vmem_to_hbm [thread:$0]  %s184_s26, 256, %s186_s29, [#allocation4], %s303_s20, %s303_s20, %s304_s21  }
  0xd1   :  { %300 = dma.done.wait [#allocation4], 256  }
  0xd2   :  { %301 = vsyncadd [#allocation4], 4294967040 }
  0xd3   :  { %196 = vsyncpa [#allocation3], 1 }
  0xd4   :  { %197 = vsyncpa [#allocation6], 1 }
  0xd5   :  { %198 = vsyncpa [#allocation4], 1 }

</bundles_post_ra>
